<compile_context>
chip_gen: v5e
topology: v5e:2x2
jax: 0.10.0
libtpu: 0.0.40
codegen_flags: <defaults>
</compile_context>

<pallas_src>
import jax
import jax.numpy as jnp
from jax import lax
from jax.experimental import pallas as pl
from jax.experimental.pallas import tpu as pltpu

BN_EPS = 1e-5


# ---------------------------------------------------------------------------
# Pass 1: packed phase matmul -> per-tile BatchNorm partials (sum, centered M2).
# ---------------------------------------------------------------------------
def _stats_kernel(x_ref, w_ref, st_ref):
    # x_ref : (TRp, Kp)   bf16 -- r original rows packed along lanes (lane-dense)
    # w_ref : (Kp, Np)    bf16 -- block-diagonal kron(I_r, W4)
    # st_ref: (1, 2, Np)  f32  -- row 0: per-column sum, row 1: per-column centered M2
    acc = jnp.dot(x_ref[...], w_ref[...], preferred_element_type=jnp.float32)
    rows = acc.shape[0]
    # Column reductions as ones-matmuls: MXU is idle (K is tiny), VPU/XLU are not.
    ones = jnp.ones((8, rows), jnp.float32)                  # 8 identical rows: MXU-friendly M
    s = jnp.dot(ones, acc, preferred_element_type=jnp.float32)[0:1, :]
    mu = s * (1.0 / rows)
    d = acc - mu                                             # centered -> numerically stable
    m2 = jnp.dot(ones, d * d, preferred_element_type=jnp.float32)[0:1, :]
    st_ref[:, 0, :] = s
    st_ref[:, 1, :] = m2


# ---------------------------------------------------------------------------
# Pass 2: recomputed packed matmul + fused BatchNorm scale/shift + ReLU.
# ---------------------------------------------------------------------------
def _conv_bn_relu_kernel(x_ref, w_ref, scale_ref, shift_ref, o_ref):
    acc = jnp.dot(x_ref[...], w_ref[...], preferred_element_type=jnp.float32)
    o_ref[...] = jnp.maximum(acc * scale_ref[...] + shift_ref[...], 0.0)


# ---------------------------------------------------------------------------
# Helpers
# ---------------------------------------------------------------------------
def _cdiv(a, b):
    return -(-a // b)


def _next_pow2(n):
    p = 1
    while p < n:
        p *= 2
    return p


def _vmem_capacity_bytes():
    try:
        return int(pltpu.get_tpu_info().vmem_capacity_bytes)
    except Exception:
        return 64 << 20  # conservative fallback (v7x per-TensorCore)


def _pick_tile_rows(m_p, k_p, n_p, vmem_cap):
    """Largest power-of-two packed-row tile such that the double-buffered
    per-pass footprint stays within ~1/3 of VMEM capacity (capacity-derived:
    v5e/v6e get 2-4k row tiles, v7x stays well inside 64 MiB) and the grid has
    >= 4 steps so each v7x core still overlaps DMA with compute."""
    per_row = k_p * 2 + n_p * 4                    # bf16 LHS + f32 out, per packed row
    budget = max(vmem_cap // 3, 4 << 20)
    cap_rows = max(budget // (2 * per_row), 8)     # 2x: double buffering
    limit = max(min(cap_rows, max(m_p // 4, 8)), 8)
    tr = 8
    while tr * 2 <= limit and tr * 2 <= 4096:
        tr *= 2
    return tr


def _pack_weight(w):
    """(Cin, Cout, 3, 3) ConvTranspose2d weight -> (4*Cin, 4*Cout) packed block
    matrix.  Tap order (rows): x[p,q], x[p,q+1], x[p+1,q], x[p+1,q+1];
    phase order (cols): (dy,dx) = (0,0),(0,1),(1,0),(1,1).
    Derived from oy = 2*iy + kh - 1, ox = 2*ix + kw - 1 (stride 2, pad 1)."""
    cin, cout = w.shape[0], w.shape[1]
    wp = jnp.zeros((4, cin, 4, cout), jnp.float32)
    taps = [  # (tap, phase, kh, kw)
        (0, 0, 1, 1), (0, 1, 1, 2), (0, 2, 2, 1), (0, 3, 2, 2),
        (1, 1, 1, 0), (1, 3, 2, 0),
        (2, 2, 0, 1), (2, 3, 0, 2),
        (3, 3, 0, 0),
    ]
    for t, ph, kh, kw in taps:
        wp = wp.at[t, :, ph, :].set(w[:, :, kh, kw])
    return wp.reshape(4 * cin, 4 * cout)


# ---------------------------------------------------------------------------
# Forward
# ---------------------------------------------------------------------------
def conv_trans2d(x_nchw, w, b, gamma, beta):
    """Forward of ConvTrans2d.  x: (N, Cin, H, W); w: (Cin, Cout, 3, 3)."""
    del b  # per-channel conv bias cancels exactly under training-mode BatchNorm
    N, Cin, H, W = x_nchw.shape
    Cout = w.shape[1]
    C4in, C4out = 4 * Cin, 4 * Cout
    M = N * H * W

    # Replication factor so kernel output blocks are lane-dense (>= 128 lanes).
    r = _next_pow2(_cdiv(128, C4out)) if C4out < 128 else 1
    Kp, Np = r * C4in, r * C4out

    # --- glue (bf16): NHWC, high-pad by 1, 4 shifted taps --------------------
    x = x_nchw.astype(jnp.bfloat16).transpose(0, 2, 3, 1)             # NHWC bf16
    xp = jnp.pad(x, ((0, 0), (0, 1), (0, 1), (0, 0)))
    x_cat = jnp.concatenate(
        [xp[:, :H, :W, :], xp[:, :H, 1:, :],
         xp[:, 1:, :W, :], xp[:, 1:, 1:, :]], axis=-1).reshape(M, C4in)
    # TODO(synk): gather the 4 taps in-kernel from a (th+1, W+1, Cin) halo block
    # (manual DMA) to avoid materializing the 4x-duplicated x_cat in HBM.

    w4 = _pack_weight(w.astype(jnp.float32))
    w_p = jnp.kron(jnp.eye(r, dtype=jnp.float32), w4).astype(jnp.bfloat16)  # (Kp, Np)

    vmem_cap = _vmem_capacity_bytes()
    Mp = _cdiv(M, r)
    TRp = _pick_tile_rows(Mp, Kp, Np, vmem_cap)
    G = _cdiv(Mp, TRp)
    Mp_pad = G * TRp
    M_pad = Mp_pad * r

    x_cat = jnp.pad(x_cat, ((0, M_pad - M), (0, 0)))                  # zero rows -> acc == 0
    x_p = x_cat.reshape(Mp_pad, Kp)                                   # free (row-major)

    # --- pass 1: stats only ---------------------------------------------------
    p1_bytes = 2 * (TRp * Kp * 2) + 2 * (Kp * Np * 2) + 2 * (2 * Np * 4)
    stats = pl.pallas_call(
        _stats_kernel,
        out_shape=jax.ShapeDtypeStruct((G, 2, Np), jnp.float32),
        grid=(G,),
        in_specs=[
            pl.BlockSpec((TRp, Kp), lambda i: (i, 0)),
            pl.BlockSpec((Kp, Np), lambda i: (0, 0)),
        ],
        out_specs=pl.BlockSpec((1, 2, Np), lambda i: (i, 0, 0)),
        compiler_params=pltpu.CompilerParams(
            dimension_semantics=("parallel",),
            vmem_limit_bytes=int(min(max(p1_bytes + (2 << 20), 16 << 20),
                                     (vmem_cap * 3) // 4)),
        ),
    )(x_p, w_p)

    # --- exact Chan-style combine (padding-aware, tiny) -----------------------
    s_all = stats[:, 0, :].reshape(G, r, 4, Cout)
    m2_all = stats[:, 1, :].reshape(G, r, 4, Cout)

    g_idx = jnp.arange(G, dtype=jnp.int32)[:, None]                   # (G,1)
    rep_idx = jnp.arange(r, dtype=jnp.int32)[None, :]                 # (1,r)
    rem = M - g_idx * (TRp * r) - rep_idx
    n_valid = jnp.clip((rem + r - 1) // r, 0, TRp).astype(jnp.float32)  # (G,r)
    n = n_valid[:, :, None, None]
    n_pad = TRp - n

    n_total = 4.0 * M                                                 # N * 2H * 2W per channel
    mean = s_all.sum(axis=(0, 1, 2)) / n_total                        # (Cout,) exact (pads sum to 0)
    c = s_all * (1.0 / TRp)                                           # kernel's per-tile center
    diff = mean[None, None, None, :] - c
    m2 = (m2_all - n_pad * c * c                                      # remove padded rows' (0-c)^2
          - 2.0 * diff * (s_all - n * c) + n * diff * diff            # recenter to global mean
          ).sum(axis=(0, 1, 2))
    var = m2 / n_total                                                # biased, like torch BN (train)
    inv = lax.rsqrt(var + BN_EPS)
    scale = gamma.astype(jnp.float32) * inv
    shift = beta.astype(jnp.float32) - mean * scale
    scale_p = jnp.tile(scale, 4 * r).reshape(1, Np)                   # (rep, phase, ch) column order
    shift_p = jnp.tile(shift, 4 * r).reshape(1, Np)

    # --- pass 2: recomputed matmul + fused BN + ReLU ---------------------------
    p2_bytes = (2 * (TRp * Kp * 2) + 2 * (Kp * Np * 2)
                + 2 * (TRp * Np * 4) + 4 * (Np * 4))
    out_p = pl.pallas_call(
        _conv_bn_relu_kernel,
        out_shape=jax.ShapeDtypeStruct((Mp_pad, Np), jnp.float32),
        grid=(G,),
        in_specs=[
            pl.BlockSpec((TRp, Kp), lambda i: (i, 0)),
            pl.BlockSpec((Kp, Np), lambda i: (0, 0)),
            pl.BlockSpec((1, Np), lambda i: (0, 0)),
            pl.BlockSpec((1, Np), lambda i: (0, 0)),
        ],
        out_specs=pl.BlockSpec((TRp, Np), lambda i: (i, 0)),
        compiler_params=pltpu.CompilerParams(
            dimension_semantics=("parallel",),
            vmem_limit_bytes=int(min(max(p2_bytes + (2 << 20), 16 << 20),
                                     (vmem_cap * 3) // 4)),
        ),
    )(x_p, w_p, scale_p, shift_p)

    # --- depth-to-space + NCHW in ONE fused transpose --------------------------
    # TODO(synk): emit NHWC directly from pass 2 (phase-offset out_specs) and skip
    # this copy when downstream consumes channels-last.
    y = out_p.reshape(M_pad, C4out)[:M]
    o6 = y.reshape(N, H, W, 2, 2, Cout)                               # (N,H,W,dy,dx,C)
    return o6.transpose(0, 5, 1, 3, 2, 4).reshape(N, Cout, 2 * H, 2 * W)


# ---------------------------------------------------------------------------
# Pure-JAX reference (ConvTranspose2d + training-mode BN + ReLU)
# ---------------------------------------------------------------------------
def _reference(x_nchw, w, b, gamma, beta, matmul_dtype=jnp.float32):
    rhs = jnp.flip(w, axis=(2, 3)).transpose(1, 0, 2, 3)              # (Cout, Cin, 3, 3)
    y = lax.conv_general_dilated(
        x_nchw.astype(matmul_dtype), rhs.astype(matmul_dtype),
        window_strides=(1, 1), padding=[(1, 2), (1, 2)],
        lhs_dilation=(2, 2), rhs_dilation=(1, 1),
        dimension_numbers=("NCHW", "OIHW", "NCHW"),
        preferred_element_type=jnp.float32)
    y = y + b[None, :, None, None]
    mean = y.mean(axis=(0, 2, 3), keepdims=True)
    var = y.var(axis=(0, 2, 3), keepdims=True)                        # biased, like PyTorch BN
    y = gamma[None, :, None, None] * (y - mean) * lax.rsqrt(var + BN_EPS) \
        + beta[None, :, None, None]
    return jnp.maximum(y, 0.0)


if __name__ == "__main__":
    key = jax.random.PRNGKey(0)
    k_x, k_w, k_b, k_g, k_bt = jax.random.split(key, 5)

    N, in_ch, out_ch, H, W = 2, 4, 8, 16, 16
    x = jax.random.normal(k_x, (N, in_ch, H, W), jnp.float32)
    w = jax.random.normal(k_w, (in_ch, out_ch, 3, 3), jnp.float32) * 0.1
    b = jax.random.normal(k_b, (out_ch,), jnp.float32) * 0.1
    gamma = 1.0 + 0.1 * jax.random.normal(k_g, (out_ch,), jnp.float32)
    beta = 0.1 * jax.random.normal(k_bt, (out_ch,), jnp.float32)

    out = jax.block_until_ready(conv_trans2d(x, w, b, gamma, beta))
    assert out.shape == (N, out_ch, 2 * H, 2 * W), out.shape

    # Tight check against a reference using the same bf16 MXU operand precision.
    ref_bf = jax.block_until_ready(_reference(x, w, b, gamma, beta, jnp.bfloat16))
    assert jnp.allclose(out, ref_bf, atol=2e-3, rtol=2e-3), \
        float(jnp.max(jnp.abs(out - ref_bf)))

    # Looser check against the full-f32 reference (bf16 operand quantization only).
    ref_f32 = jax.block_until_ready(_reference(x, w, b, gamma, beta, jnp.float32))
    assert jnp.allclose(out, ref_f32, atol=2e-2, rtol=2e-2), \
        float(jnp.max(jnp.abs(out - ref_f32)))

    print("KERNEL_OK")
</pallas_src>

<mosaic_0001>
module attributes {stable_mosaic.version = 11 : i64} {
  func.func @_stats_kernel(%arg0: i32, %arg1: memref<32x64xbf16, #tpu.memory_space<vmem>>, %arg2: memref<64x128xbf16, #tpu.memory_space<vmem>>, %arg3: memref<1x2x128xf32, #tpu.memory_space<vmem>>) attributes {dimension_semantics = [#tpu.dimension_semantics<parallel>], iteration_bounds = array<i64: 4>, scalar_prefetch = 0 : i64, scratch_operands = 0 : i64, tpu.core_type = #tpu.core_type<tc>, window_params = [{transform_indices = @transform_0, window_bounds = array<i64: 32, 64>}, {pipeline_mode = #tpu.pipeline_mode<synchronous>, transform_indices = @transform_1, window_bounds = array<i64: 64, 128>}, {transform_indices = @transform_2, window_bounds = array<i64: 1, 2, 128>}]} {
    %c0 = arith.constant 0 : index
    %c0_0 = arith.constant 0 : index
    %0 = vector.load %arg1[%c0, %c0_0] : memref<32x64xbf16, #tpu.memory_space<vmem>>, vector<32x64xbf16>
    %c0_1 = arith.constant 0 : index
    %c0_2 = arith.constant 0 : index
    %1 = vector.load %arg2[%c0_1, %c0_2] : memref<64x128xbf16, #tpu.memory_space<vmem>>, vector<64x128xbf16>
    %cst = arith.constant dense<0.000000e+00> : vector<32x128xf32>
    %2 = tpu.matmul %0, %1, %cst {dimension_numbers = #tpu.dot_dimension_numbers<[1], [0], [0], [1], [0, 0, 1, 1], [], []>} : vector<32x64xbf16>, vector<64x128xbf16>, vector<32x128xf32> -> vector<32x128xf32>
    %cst_3 = arith.constant 1.000000e+00 : f32
    %3 = vector.broadcast %cst_3 : f32 to vector<8x32xf32>
    %cst_4 = arith.constant dense<0.000000e+00> : vector<8x128xf32>
    %4 = tpu.matmul %3, %2, %cst_4 {dimension_numbers = #tpu.dot_dimension_numbers<[1], [0], [0], [1], [0, 0, 1, 1], [], []>} : vector<8x32xf32>, vector<32x128xf32>, vector<8x128xf32> -> vector<8x128xf32>
    %5 = vector.extract_strided_slice %4 {offsets = [0, 0], sizes = [1, 128], strides = [1, 1]} : vector<8x128xf32> to vector<1x128xf32>
    %cst_5 = arith.constant 3.125000e-02 : f32
    %6 = vector.broadcast %cst_5 : f32 to vector<1x128xf32>
    %7 = arith.mulf %5, %6 : vector<1x128xf32>
    %8 = vector.broadcast %7 : vector<1x128xf32> to vector<32x128xf32>
    %9 = arith.subf %2, %8 : vector<32x128xf32>
    %10 = arith.mulf %9, %9 : vector<32x128xf32>
    %cst_6 = arith.constant dense<0.000000e+00> : vector<8x128xf32>
    %11 = tpu.matmul %3, %10, %cst_6 {dimension_numbers = #tpu.dot_dimension_numbers<[1], [0], [0], [1], [0, 0, 1, 1], [], []>} : vector<8x32xf32>, vector<32x128xf32>, vector<8x128xf32> -> vector<8x128xf32>
    %12 = vector.extract_strided_slice %11 {offsets = [0, 0], sizes = [1, 128], strides = [1, 1]} : vector<8x128xf32> to vector<1x128xf32>
    %c0_7 = arith.constant 0 : index
    %c0_8 = arith.constant 0 : index
    %c0_9 = arith.constant 0 : index
    %13 = vector.load %arg3[%c0_7, %c0_8, %c0_9] : memref<1x2x128xf32, #tpu.memory_space<vmem>>, vector<1x1x128xf32>
    %14 = vector.shape_cast %13 : vector<1x1x128xf32> to vector<1x128xf32>
    %15 = vector.shape_cast %5 : vector<1x128xf32> to vector<1x1x128xf32>
    tpu.vector_store %arg3[%c0_7, %c0_8, %c0_9], %15 {strides = array<i32>} : memref<1x2x128xf32, #tpu.memory_space<vmem>>, vector<1x1x128xf32>,
    %c0_10 = arith.constant 0 : index
    %c1 = arith.constant 1 : index
    %c0_11 = arith.constant 0 : index
    %16 = vector.load %arg3[%c0_10, %c1, %c0_11] : memref<1x2x128xf32, #tpu.memory_space<vmem>>, vector<1x1x128xf32>
    %17 = vector.shape_cast %16 : vector<1x1x128xf32> to vector<1x128xf32>
    %18 = vector.shape_cast %12 : vector<1x128xf32> to vector<1x1x128xf32>
    tpu.vector_store %arg3[%c0_10, %c1, %c0_11], %18 {strides = array<i32>} : memref<1x2x128xf32, #tpu.memory_space<vmem>>, vector<1x1x128xf32>,
    return
  }
  func.func @transform_0(%arg0: i32) -> (i32, i32) {
    %c0_i32 = arith.constant 0 : i32
    %c0_i32_0 = arith.constant 0 : i32
    return %arg0, %c0_i32 : i32, i32
  }
  func.func @transform_1(%arg0: i32) -> (i32, i32) {
    %c0_i32 = arith.constant 0 : i32
    %c0_i32_0 = arith.constant 0 : i32
    %c0_i32_1 = arith.constant 0 : i32
    return %c0_i32, %c0_i32_0 : i32, i32
  }
  func.func @transform_2(%arg0: i32) -> (i32, i32, i32) {
    %c0_i32 = arith.constant 0 : i32
    %c0_i32_0 = arith.constant 0 : i32
    %c0_i32_1 = arith.constant 0 : i32
    return %arg0, %c0_i32, %c0_i32_0 : i32, i32, i32
  }
}

</mosaic_0001>

<bundles_post_ra>
// kernel: tpu_custom_call.1
= control target key start
LH: loop header
LB: loop body
LE: loop exit
PB: predicated region body
PF: predicated region fallthrough
CT: control target
= control target key end

     0   :  { %7 = vsyncpa [#allocation3], 0  ;;  %s615_s0 = inlined_call_operand.vmem [shape: bf16[128,64], index: 0, kind: input, shape index: {}]   ;;  %s616_s1 = inlined_call_operand.vmem [shape: bf16[64,128], index: 1, kind: input, shape index: {}]   ;;  %s617_s2 = inlined_call_operand.hbm [shape: f32[4,2,128], index: 2, kind: output, shape index: {}]  }
   0x1   :  { %9 = vsyncpa [#allocation3 + $0x1], 0  ;;  %s517_s9 = smov 0   ;;  %s519_s10 = smov 0  }
   0x2   :  { %s521_s11 = smov 0   ;;  %s523_s12 = smov 0  }
   0x3 LB: > { %s538_s13 = sadd.s32 4294967295, %s499_s12   ;;  %s348_s14 = sadd.s32 4294967294, %s499_s12   ;;  %s499_s12 = sphi %s523_s12, %s623_s12   ;;  %s495_s11 = sphi %s521_s11, %s622_s11   ;;  %s491_s10 = sphi %s519_s10, %s621_s10   ;;  %s487_s9 = sphi %s517_s9, %s620_s9  }
   0x4   : > { %s542_s15 = sadd.s32 1, %s499_s12   ;;  %s69_s16 = sadd.s32 1, %s495_s11 }
   0x5   : > { %s66_s17 = ssub.s32 %s499_s12, %s542_s15  ;;  %p79_p0 = scmp.ne.s32.totalorder %s495_s11, %s491_s10 }
   0x6   : > { %p67_p1 = scmp.eq.s32.totalorder %s66_s17, 0  ;;  %p80_p2 = scmp.eq.s32.totalorder %s538_s13, 3 }
   0x7   : > { %p85_p3 = scmp.ne.s32.totalorder %s491_s10, %s487_s9  ;;  %p86_p4 = scmp.eq.s32.totalorder %s348_s14, 3 }
   0x8   : > { %s553_s18 = scalar_select %p67_p1, %s495_s11, %s69_s16  }
   0x9   : > { %p555_p5 = por %p80_p2, %p79_p0  ;;  %p559_p6 = por %p86_p4, %p85_p3 }
   0xa   : > { %p351_p7 = scmp.ge.s32.totalorder %s499_s12, 1  ;;  %p116_p8 = scmp.lt.s32.totalorder %s499_s12, 5 }
   0xc   : > { %p117_p9 = pnand %p351_p7, %p116_p8 }
   0xd   : > { %s353_s23 = sshll.u32 (!%p117_p9), %s538_s13, 2  ;;  %s135_s6 = sand.u32 (!%p117_p9), 1, %s491_s10  }
   0xe   : > { %120 = sbr.rel (%p117_p9) target bundleno = 458 (0x1ca), region = 28  ;;  %p139_p10 = scmp.lt.s32.totalorder (!%p117_p9), %s353_s23, 15 }
   0xf   : > { %s352_s7 = sshll.u32 (!%p117_p9), %s135_s6, 1  ;;  %s384_s14 = sshll.u32 (!%p117_p9), %s538_s13, 1 }
  0x10   : > { %s137_s8 = scalar_lea.vmem (!%p117_p9), [#allocation2], %s352_s7  ;;  %s284_s21 = scalar_lea.hbm (!%p117_p9), %s617_s2, %s384_s14 }
  0x11   : > { %s286_s22 = sshll.u32 (!%p117_p9), %s137_s8, 4  ;;  %s274_s24 = scalar_lea.sflag (!%p117_p9), [#allocation3], %s135_s6  ;;  %s287_s22 = int_to_ptr.vmem [resolvable:$true] %s286_s22 }
  0x13   : > { %v392_v0 = vld [vmem:[%s616_s1 + $0x18] sm:$0xff]  ;;  %v391_v1 = vld [vmem:[%s616_s1 + $0x10] sm:$0xff]  ;;  %s625_s23 = smov (!%p139_p10, %s353_s23), 15  ;;  %v390_v2 = vld [vmem:[%s616_s1 + $0x8] sm:$0xff]  ;;  %vm191_vm0 = vcmask 523264   ;;  %vm217_vm1 = vcmask 261120  }
  0x14   : > { %393 = vmatpush.bf16.msra.mxu3 %v392_v0  ;;  %202 = vmatpush.bf16.msra.mxu0 %v392_v0  ;;  %s354_s28 = sshll.u32 %s625_s23, 2  ;;  %v389_v3 = vld [vmem:[%s616_s1] sm:$0xff]  ;;  %v501_v10 = vmov 1.0   ;;  %s288_s23 = sshll.u32 %s284_s21, 4  ;;  %s289_s23 = int_to_ptr.hbm [resolvable:$true] %s288_s23 }
  0x15   : > { %s142_s5 = scalar_lea.vmem %s615_s0, %s354_s28  ;;  %s451_s25 = sshra.s32 %s289_s23, 4  ;;  %s452_s25 = int_to_ptr.hbm [resolvable:$true] %s451_s25 }
  0x16   : > { %v388_v4 = vld [vmem:[%s142_s5 + $0x8] sm:$0xff]  ;;  %v387_v5 = vld [vmem:[%s142_s5] sm:$0xff]  ;;  %s453_s26 = scalar_lea.hbm %s452_s25, 2  ;;  %s457_s28 = scalar_lea.hbm %s617_s2, 8 }
  0x17   : > { %p454_p11 = scmp.ne.s32.totalorder %s452_s25, %s453_s26  ;;  %p458_p0 = scmp.lt.s32.totalorder %s452_s25, %s617_s2 }
  0x18   : > { %394 = vmatpush.bf16.msra.mxu3 %v391_v1  ;;  %203 = vmatpush.bf16.msra.mxu0 %v391_v1  ;;  %p459_p1 = scmp.lt.s32.totalorder %s457_s28, %s453_s26 }
  0x19   : > { %p455_p12 = pnand %p454_p11, %p555_p5 }
  0x1a   : > { %p460_p2 = por %p459_p1, %p458_p0 }
  0x1b   : > { %p456_p13 = pneg %p455_p12 }
  0x1c   : > { %395 = vmatpush.bf16.msra.mxu3 %v390_v2  ;;  %204 = vmatpush.bf16.msra.mxu0 %v390_v2 }
  0x1d   : > { %p461_p3 = pnand %p460_p2, %p456_p13 }
  0x20   : > { %396 = vmatpush.bf16.msra.mxu3 %v389_v3  ;;  %205 = vmatpush.bf16.msra.mxu0 %v389_v3 }
  0x23   : > { %380 = vmatmul.msk.bf16.vlgmr.msra.gmra.mxu3 %vm191_vm0, %v388_v4  ;;  %379 = vmatmul.msk.bf16.vlgmr.msra.gmra.mxu0 %vm191_vm0, %v387_v5 }
  0xa0   : > { %v207_v7 = vpop.f32.mrf.mxu0 }
  0xa6   : > { %v212_v6 = vpop.f32.mrf.mxu3 }
  0xa8   : > { %v209_v9 = vpop.f32.mrf.mxu0 }
  0xae   : > { %v214_v8 = vpop.f32.mrf.mxu3 }
  0xaf   : > { %233 = vmatpush.msra.mxu1 %v214_v8 }
  0xb1   : > { %234 = vmatpush.msra.mxu1 %v212_v6 }
  0xb3   : > { %235 = vmatpush.msra.mxu1 %v209_v9 }
  0xb5   : > { %236 = vmatpush.msra.mxu1 %v207_v7 }
  0xb6   : > { %381 = vmatmul.msk.f32.vlgmr.msra.gmra.mxu1 %vm217_vm1, %v501_v10 }
 0x133   : > { %v238_v11 = vpop.f32.mrf.mxu1 }
 0x134   : > { %v241_v12 = vmul.f32 0.03125, %v238_v11  ;;  %271 = vst [vmem:[%s137_s8] sm:$0x1] %v238_v11 }
 0x136   : > { %v242_v13 = vperm.slane %v241_v12, 0 }
 0x138   : > { %v246_v14 = vsub.f32 %v214_v8, %v242_v13  ;;  %v245_v15 = vsub.f32 %v212_v6, %v242_v13  ;;  %v244_v17 = vsub.f32 %v209_v9, %v242_v13  ;;  %v243_v19 = vsub.f32 %v207_v7, %v242_v13 }
 0x13a   : > { %v250_v16 = vmul.f32 %v246_v14, %v246_v14  ;;  %v249_v18 = vmul.f32 %v245_v15, %v245_v15  ;;  %v248_v20 = vmul.f32 %v244_v17, %v244_v17  ;;  %v247_v21 = vmul.f32 %v243_v19, %v243_v19 }
 0x13c   : > { %263 = vmatpush.msra.mxu2 %v250_v16 }
 0x13e   : > { %264 = vmatpush.msra.mxu2 %v249_v18 }
 0x140   : > { %265 = vmatpush.msra.mxu2 %v248_v20 }
 0x142   : > { %266 = vmatpush.msra.mxu2 %v247_v21 }
 0x143   : > { %382 = vmatmul.msk.f32.vlgmr.msra.gmra.mxu2 %vm217_vm1, %v501_v10 }
 0x1c6   : > { %v268_v22 = vpop.f32.mrf.mxu2 }
 0x1c7   : > { %272 = vst [vmem:[%s137_s8 + $0x1] sm:$0x1] %v268_v22 }
 0x1c8   : > { %464 = shalt.err (!%p461_p3)
}
 0x1c9   : > { %397 = dma.vmem_to_hbm [thread:$0]  (%p555_p5), %s287_s22, 32, %s289_s23, %s274_s24  }
 0x1ca PF: > { %p403_p4 = scmp.ge.s32.totalorder %s499_s12, 2  ;;  %s300_s3 = sand.u32 1, %s487_s9  }
 0x1cb   : > { %s301_s4 = scalar_lea.sflag [#allocation3], %s300_s3 }
 0x1cc   : > { %p400_p7 = pnand %p403_p4, %p559_p6 }
 0x1ce   : > { %p401_p8 = pneg %p400_p7 }
 0x1d0   : > { %482 = dma.done.wait (%p401_p8), %s301_s4, 32  }
 0x1d1   : > { %484 = vsyncadd (%p401_p8), %s301_s4, 4294967264  ;;  %p12_p9 = scmp.ge.s32.totalorder %s542_s15, 6   ;;  %s620_s9 = smov %s491_s10 }
 0x1d2   : > { %s621_s10 = smov %s495_s11  ;;  %s622_s11 = smov %s553_s18 }
 0x1d3   : > { %s623_s12 = smov %s542_s15  ;;  %14 = sbr.rel (!%p12_p9) target bundleno = 3 (0x3), region = 63 }
 0x1d8   :  { %307 = vsyncpa [#allocation3], 1 }
 0x1d9   :  { %309 = vsyncpa [#allocation3 + $0x1], 1 }

</bundles_post_ra>
